<compile_context>
chip_gen: v5e
topology: v5e:2x2
jax: 0.10.0
libtpu: 0.0.40
codegen_flags: <defaults>
</compile_context>

<pallas_src>
import functools

import numpy as np
import jax
import jax.numpy as jnp
from jax import lax
from jax.experimental import pallas as pl
from jax.experimental.pallas import tpu as pltpu

NEG_SLOPE = 0.2


def _lrelu(v):
    return jnp.where(v > 0, v, NEG_SLOPE * v)


def _im2col_taps(a, H, W):
    """im2col for a 3x3 'same' conv on a lane-major activation.

    a: (C, H*W) f32, lane index = h*W + w.
    Returns a list of 9 (C, H*W) arrays, tap order t = ky*3 + kx; tap t at lane (h, w)
    holds a[c, (h+ky-1)*W + (w+kx-1)] with zeros outside the image.
    Implemented as static lane slices of a flat zero-padded buffer + per-column masks,
    so no 2-D pad scratch and no cross-tile reshapes are needed.
    """
    C, HW = a.shape
    P = W + 1  # enough zero padding for the largest |offset| = W + 1
    zpad = jnp.zeros((C, P), a.dtype)
    apad = jnp.concatenate([zpad, a, zpad], axis=1)           # (C, HW + 2P)

    lane = lax.broadcasted_iota(jnp.int32, (1, HW), 1)
    col = lane % W
    not_first_col = col >= 1           # needed for dx = -1 taps
    not_last_col = col <= W - 2        # needed for dx = +1 taps

    pieces = []
    for ky in range(3):
        for kx in range(3):
            dy, dx = ky - 1, kx - 1
            off = dy * W + dx
            start = P + off
            v = apad[:, start:start + HW]                     # static lane slice
            if dx == -1:
                v = jnp.where(not_first_col, v, 0.0)
            elif dx == 1:
                v = jnp.where(not_last_col, v, 0.0)
            # rows that fall outside the image land in the zero pad automatically.
            pieces.append(v)
    return pieces


def resblock_kernel(x_ref, wc1_ref, bc1_ref, w2_ref, b2_ref, pool_ref, o_ref,
                    *, H, W, cout):
    # x_ref   : (1, Cin, H*W)   one batch element, NCHW-flat (lane = h*W + w)
    # wc1_ref : (2*Cout, Cin + 9*Cin)   block-diag [shortcut ; conv1] weight
    # bc1_ref : (2*Cout, 1)             [b_s ; b1]
    # w2_ref  : (Cout, 9*Cout), b2_ref : (Cout, 1)
    # pool_ref: (H*W, H*W/4)            2x2 average-pool matrix (0.25 entries)
    # o_ref   : (1, Cout, H*W/4)
    x = x_ref[0].astype(jnp.float32)                           # (Cin, HW)
    lx = _lrelu(x)

    # ---- fused shortcut (1x1) + conv1 (3x3): one MXU matmul -> [xs ; d1] ----
    rhs1 = jnp.concatenate([x] + _im2col_taps(lx, H, W), axis=0)   # (Cin + 9*Cin, HW)
    r1 = jnp.dot(wc1_ref[...], rhs1,
                 preferred_element_type=jnp.float32) + bc1_ref[...]
    xs = r1[:cout]                                             # (Cout, HW) shortcut
    d1 = r1[cout:]                                             # (Cout, HW) conv1 output

    # ---- conv2: lrelu + 3x3 conv ----
    p2 = jnp.concatenate(_im2col_taps(_lrelu(d1), H, W), axis=0)   # (9*Cout, HW)
    d2 = jnp.dot(w2_ref[...], p2,
                 preferred_element_type=jnp.float32) + b2_ref[...]

    # ---- out = AvgPool2(xs) + AvgPool2(d2) == (xs + d2) @ Pool ----
    s = xs + d2                                                # (Cout, HW)
    out = jnp.dot(s, pool_ref[...], preferred_element_type=jnp.float32)  # (Cout, HW/4)
    o_ref[0] = out.astype(o_ref.dtype)


def resblock_forward(x_nchw, params):
    """ResBlock forward (up_or_down=-1, first=False, learned_shortcut=True), NCHW in/out."""
    N, Cin, H, W = x_nchw.shape
    Cout = params["w1"].shape[0]
    HW = H * W
    HWp = (H // 2) * (W // 2)

    x_flat = x_nchw.reshape(N, Cin, HW)                        # free (contiguous) reshape

    # Conv weights (Cout, Cin, 3, 3) -> (Cout, 9*Cin), column order (ky, kx, cin)
    # matching the tap-major / cin-minor row order of the im2col patches.
    w1_t = jnp.transpose(params["w1"], (0, 2, 3, 1)).reshape(Cout, 9 * Cin)
    w2_t = jnp.transpose(params["w2"], (0, 2, 3, 1)).reshape(Cout, 9 * Cout)
    ws = params["w_s"].reshape(Cout, Cin)

    # Block-diagonal merge of the 1x1 shortcut with conv1.
    wc1 = jnp.zeros((2 * Cout, Cin + 9 * Cin), jnp.float32)
    wc1 = wc1.at[:Cout, :Cin].set(ws)
    wc1 = wc1.at[Cout:, Cin:].set(w1_t)
    bc1 = jnp.concatenate([params["b_s"], params["b1"]]).reshape(2 * Cout, 1)
    b2 = params["b2"].reshape(Cout, 1)

    # 2x2 average pool as a constant matmul on the flattened spatial (lane) axis.
    pool_np = np.zeros((HW, HWp), np.float32)
    for h in range(H):
        for w in range(W):
            pool_np[h * W + w, (h // 2) * (W // 2) + (w // 2)] = 0.25
    pool = jnp.asarray(pool_np)

    kernel = functools.partial(resblock_kernel, H=H, W=W, cout=Cout)

    out = pl.pallas_call(
        kernel,
        out_shape=jax.ShapeDtypeStruct((N, Cout, HWp), x_nchw.dtype),
        grid=(N,),
        in_specs=[
            pl.BlockSpec((1, Cin, HW), lambda n: (n, 0, 0)),
            pl.BlockSpec((2 * Cout, Cin + 9 * Cin), lambda n: (0, 0)),
            pl.BlockSpec((2 * Cout, 1), lambda n: (0, 0)),
            pl.BlockSpec((Cout, 9 * Cout), lambda n: (0, 0)),
            pl.BlockSpec((Cout, 1), lambda n: (0, 0)),
            pl.BlockSpec((HW, HWp), lambda n: (0, 0)),
        ],
        out_specs=pl.BlockSpec((1, Cout, HWp), lambda n: (n, 0, 0)),
        compiler_params=pltpu.CompilerParams(dimension_semantics=("parallel",)),
    )(x_flat, wc1, bc1, w2_t, b2, pool)

    return out.reshape(N, Cout, H // 2, W // 2)                # free reshape, NCHW out


# ---------------------------------------------------------------------------
# Pure-JAX reference (for correctness check), NCHW throughout.
# ---------------------------------------------------------------------------
def ref_forward(x, params):
    def conv3(v, w, b):
        y = lax.conv_general_dilated(v, w, (1, 1), "SAME",
                                     dimension_numbers=("NCHW", "OIHW", "NCHW"))
        return y + b.reshape(1, -1, 1, 1)

    def avgpool2(v):
        n, c, h, w = v.shape
        return v.reshape(n, c, h // 2, 2, w // 2, 2).mean(axis=(3, 5))

    xs = jnp.einsum("oc,nchw->nohw", params["w_s"], x) + params["b_s"].reshape(1, -1, 1, 1)
    xs = avgpool2(xs)
    d = conv3(_lrelu(x), params["w1"], params["b1"])
    d = conv3(_lrelu(d), params["w2"], params["b2"])
    return xs + avgpool2(d)


# ---------------------------------------------------------------------------
if __name__ == "__main__":
    key = jax.random.PRNGKey(0)
    fin, fout = 4, 8
    N, H, W = 2, 16, 16

    k = jax.random.split(key, 7)
    params = {
        "w1": 0.1 * jax.random.normal(k[0], (fout, fin, 3, 3), jnp.float32),
        "b1": 0.1 * jax.random.normal(k[1], (fout,), jnp.float32),
        "w2": 0.1 * jax.random.normal(k[2], (fout, fout, 3, 3), jnp.float32),
        "b2": 0.1 * jax.random.normal(k[3], (fout,), jnp.float32),
        "w_s": 0.1 * jax.random.normal(k[4], (fout, fin), jnp.float32),
        "b_s": 0.1 * jax.random.normal(k[5], (fout,), jnp.float32),
    }
    x = jax.random.normal(k[6], (N, fin, H, W), jnp.float32)   # NCHW input

    fwd = jax.jit(resblock_forward)
    out = jax.block_until_ready(fwd(x, params))
    ref = jax.block_until_ready(ref_forward(x, params))

    assert out.shape == (N, fout, H // 2, W // 2), out.shape
    err = float(jnp.max(jnp.abs(out - ref)))
    assert jnp.allclose(out, ref, atol=1e-4, rtol=1e-4), err
    print("KERNEL_OK")
</pallas_src>

<mosaic_0001>
module attributes {stable_mosaic.version = 11 : i64} {
  func.func @resblock_kernel(%arg0: i32, %arg1: memref<1x4x256xf32, #tpu.memory_space<vmem>>, %arg2: memref<16x40xf32, #tpu.memory_space<vmem>>, %arg3: memref<16x1xf32, #tpu.memory_space<vmem>>, %arg4: memref<8x72xf32, #tpu.memory_space<vmem>>, %arg5: memref<8x1xf32, #tpu.memory_space<vmem>>, %arg6: memref<256x64xf32, #tpu.memory_space<vmem>>, %arg7: memref<1x8x64xf32, #tpu.memory_space<vmem>>) attributes {dimension_semantics = [#tpu.dimension_semantics<parallel>], iteration_bounds = array<i64: 2>, scalar_prefetch = 0 : i64, scratch_operands = 0 : i64, tpu.core_type = #tpu.core_type<tc>, window_params = [{transform_indices = @transform_0, window_bounds = array<i64: 1, 4, 256>}, {pipeline_mode = #tpu.pipeline_mode<synchronous>, transform_indices = @transform_1, window_bounds = array<i64: 16, 40>}, {pipeline_mode = #tpu.pipeline_mode<synchronous>, transform_indices = @transform_2, window_bounds = array<i64: 16, 1>}, {pipeline_mode = #tpu.pipeline_mode<synchronous>, transform_indices = @transform_3, window_bounds = array<i64: 8, 72>}, {pipeline_mode = #tpu.pipeline_mode<synchronous>, transform_indices = @transform_4, window_bounds = array<i64: 8, 1>}, {pipeline_mode = #tpu.pipeline_mode<synchronous>, transform_indices = @transform_5, window_bounds = array<i64: 256, 64>}, {transform_indices = @transform_6, window_bounds = array<i64: 1, 8, 64>}]} {
    %c0 = arith.constant 0 : index
    %c0_0 = arith.constant 0 : index
    %c0_1 = arith.constant 0 : index
    %0 = vector.load %arg1[%c0, %c0_0, %c0_1] : memref<1x4x256xf32, #tpu.memory_space<vmem>>, vector<1x4x256xf32>
    %1 = vector.shape_cast %0 : vector<1x4x256xf32> to vector<4x256xf32>
    %cst = arith.constant 0.000000e+00 : f32
    %2 = vector.broadcast %cst : f32 to vector<4x256xf32>
    %3 = arith.cmpf ogt, %1, %2 : vector<4x256xf32>
    %cst_2 = arith.constant 2.000000e-01 : f32
    %4 = vector.broadcast %cst_2 : f32 to vector<4x256xf32>
    %5 = arith.mulf %4, %1 : vector<4x256xf32>
    %6 = arith.select %3, %1, %5 : vector<4x256xi1>, vector<4x256xf32>
    %cst_3 = arith.constant 0.000000e+00 : f32
    %7 = vector.broadcast %cst_3 : f32 to vector<4x17xf32>
    %8 = tpu.concatenate %7, %6, %7 in 1 : vector<4x17xf32>, vector<4x256xf32>, vector<4x17xf32> -> vector<4x290xf32>
    %9 = tpu.iota {dimensions = array<i32: 1>} : vector<1x256xi32>
    %c16_i32 = arith.constant 16 : i32
    %c0_i32 = arith.constant 0 : i32
    %10 = arith.cmpi eq, %c16_i32, %c0_i32 : i32
    %c1_i32 = arith.constant 1 : i32
    %11 = arith.select %10, %c1_i32, %c16_i32 : i32
    %12 = vector.broadcast %11 : i32 to vector<1x256xi32>
    %13 = arith.remsi %9, %12 : vector<1x256xi32>
    %c0_i32_4 = arith.constant 0 : i32
    %14 = vector.broadcast %c0_i32_4 : i32 to vector<1x256xi32>
    %15 = arith.cmpi ne, %13, %14 : vector<1x256xi32>
    %c0_i32_5 = arith.constant 0 : i32
    %16 = vector.broadcast %c0_i32_5 : i32 to vector<1x256xi32>
    %17 = arith.cmpi slt, %13, %16 : vector<1x256xi32>
    %c0_i32_6 = arith.constant 0 : i32
    %18 = arith.cmpi slt, %11, %c0_i32_6 : i32
    %19 = vector.broadcast %18 : i1 to vector<1x256xi1>
    %20 = vector.broadcast %19 : vector<1x256xi1> to vector<1x256xi1>
    %21 = arith.xori %17, %20 : vector<1x256xi1>
    %22 = arith.andi %21, %15 : vector<1x256xi1>
    %23 = vector.broadcast %11 : i32 to vector<1x256xi32>
    %24 = arith.addi %13, %23 : vector<1x256xi32>
    %25 = arith.select %22, %24, %13 : vector<1x256xi1>, vector<1x256xi32>
    %c1_i32_7 = arith.constant 1 : i32
    %26 = vector.broadcast %c1_i32_7 : i32 to vector<1x256xi32>
    %27 = arith.cmpi sge, %25, %26 : vector<1x256xi32>
    %c14_i32 = arith.constant 14 : i32
    %28 = vector.broadcast %c14_i32 : i32 to vector<1x256xi32>
    %29 = arith.cmpi sle, %25, %28 : vector<1x256xi32>
    %30 = vector.extract_strided_slice %8 {offsets = [0, 0], sizes = [4, 256], strides = [1, 1]} : vector<4x290xf32> to vector<4x256xf32>
    %cst_8 = arith.constant 0.000000e+00 : f32
    %31 = vector.shape_cast %27 : vector<1x256xi1> to vector<1x256xi1>
    %32 = vector.broadcast %31 : vector<1x256xi1> to vector<4x256xi1>
    %33 = vector.broadcast %cst_8 : f32 to vector<4x256xf32>
    %34 = arith.select %32, %30, %33 : vector<4x256xi1>, vector<4x256xf32>
    %35 = vector.extract_strided_slice %8 {offsets = [0, 1], sizes = [4, 256], strides = [1, 1]} : vector<4x290xf32> to vector<4x256xf32>
    %36 = vector.extract_strided_slice %8 {offsets = [0, 2], sizes = [4, 256], strides = [1, 1]} : vector<4x290xf32> to vector<4x256xf32>
    %cst_9 = arith.constant 0.000000e+00 : f32
    %37 = vector.shape_cast %29 : vector<1x256xi1> to vector<1x256xi1>
    %38 = vector.broadcast %37 : vector<1x256xi1> to vector<4x256xi1>
    %39 = vector.broadcast %cst_9 : f32 to vector<4x256xf32>
    %40 = arith.select %38, %36, %39 : vector<4x256xi1>, vector<4x256xf32>
    %41 = vector.extract_strided_slice %8 {offsets = [0, 16], sizes = [4, 256], strides = [1, 1]} : vector<4x290xf32> to vector<4x256xf32>
    %cst_10 = arith.constant 0.000000e+00 : f32
    %42 = vector.shape_cast %27 : vector<1x256xi1> to vector<1x256xi1>
    %43 = vector.broadcast %42 : vector<1x256xi1> to vector<4x256xi1>
    %44 = vector.broadcast %cst_10 : f32 to vector<4x256xf32>
    %45 = arith.select %43, %41, %44 : vector<4x256xi1>, vector<4x256xf32>
    %46 = vector.extract_strided_slice %8 {offsets = [0, 17], sizes = [4, 256], strides = [1, 1]} : vector<4x290xf32> to vector<4x256xf32>
    %47 = vector.extract_strided_slice %8 {offsets = [0, 18], sizes = [4, 256], strides = [1, 1]} : vector<4x290xf32> to vector<4x256xf32>
    %cst_11 = arith.constant 0.000000e+00 : f32
    %48 = vector.shape_cast %29 : vector<1x256xi1> to vector<1x256xi1>
    %49 = vector.broadcast %48 : vector<1x256xi1> to vector<4x256xi1>
    %50 = vector.broadcast %cst_11 : f32 to vector<4x256xf32>
    %51 = arith.select %49, %47, %50 : vector<4x256xi1>, vector<4x256xf32>
    %52 = vector.extract_strided_slice %8 {offsets = [0, 32], sizes = [4, 256], strides = [1, 1]} : vector<4x290xf32> to vector<4x256xf32>
    %cst_12 = arith.constant 0.000000e+00 : f32
    %53 = vector.shape_cast %27 : vector<1x256xi1> to vector<1x256xi1>
    %54 = vector.broadcast %53 : vector<1x256xi1> to vector<4x256xi1>
    %55 = vector.broadcast %cst_12 : f32 to vector<4x256xf32>
    %56 = arith.select %54, %52, %55 : vector<4x256xi1>, vector<4x256xf32>
    %57 = vector.extract_strided_slice %8 {offsets = [0, 33], sizes = [4, 256], strides = [1, 1]} : vector<4x290xf32> to vector<4x256xf32>
    %58 = vector.extract_strided_slice %8 {offsets = [0, 34], sizes = [4, 256], strides = [1, 1]} : vector<4x290xf32> to vector<4x256xf32>
    %cst_13 = arith.constant 0.000000e+00 : f32
    %59 = vector.shape_cast %29 : vector<1x256xi1> to vector<1x256xi1>
    %60 = vector.broadcast %59 : vector<1x256xi1> to vector<4x256xi1>
    %61 = vector.broadcast %cst_13 : f32 to vector<4x256xf32>
    %62 = arith.select %60, %58, %61 : vector<4x256xi1>, vector<4x256xf32>
    %63 = tpu.concatenate %1, %34, %35, %40, %45, %46, %51, %56, %57, %62 in 0 : vector<4x256xf32>, vector<4x256xf32>, vector<4x256xf32>, vector<4x256xf32>, vector<4x256xf32>, vector<4x256xf32>, vector<4x256xf32>, vector<4x256xf32>, vector<4x256xf32>, vector<4x256xf32> -> vector<40x256xf32>
    %c0_14 = arith.constant 0 : index
    %c0_15 = arith.constant 0 : index
    %64 = vector.load %arg2[%c0_14, %c0_15] : memref<16x40xf32, #tpu.memory_space<vmem>>, vector<16x40xf32>
    %cst_16 = arith.constant dense<0.000000e+00> : vector<16x256xf32>
    %65 = tpu.matmul %64, %63, %cst_16 {dimension_numbers = #tpu.dot_dimension_numbers<[1], [0], [0], [1], [0, 0, 1, 1], [], []>} : vector<16x40xf32>, vector<40x256xf32>, vector<16x256xf32> -> vector<16x256xf32>
    %c0_17 = arith.constant 0 : index
    %c0_18 = arith.constant 0 : index
    %66 = vector.load %arg3[%c0_17, %c0_18] : memref<16x1xf32, #tpu.memory_space<vmem>>, vector<16x1xf32>
    %67 = vector.broadcast %66 : vector<16x1xf32> to vector<16x256xf32>
    %68 = arith.addf %65, %67 : vector<16x256xf32>
    %69 = vector.extract_strided_slice %68 {offsets = [0, 0], sizes = [8, 256], strides = [1, 1]} : vector<16x256xf32> to vector<8x256xf32>
    %70 = vector.extract_strided_slice %68 {offsets = [8, 0], sizes = [8, 256], strides = [1, 1]} : vector<16x256xf32> to vector<8x256xf32>
    %cst_19 = arith.constant 0.000000e+00 : f32
    %71 = vector.broadcast %cst_19 : f32 to vector<8x256xf32>
    %72 = arith.cmpf ogt, %70, %71 : vector<8x256xf32>
    %cst_20 = arith.constant 2.000000e-01 : f32
    %73 = vector.broadcast %cst_20 : f32 to vector<8x256xf32>
    %74 = arith.mulf %73, %70 : vector<8x256xf32>
    %75 = arith.select %72, %70, %74 : vector<8x256xi1>, vector<8x256xf32>
    %cst_21 = arith.constant 0.000000e+00 : f32
    %76 = vector.broadcast %cst_21 : f32 to vector<8x17xf32>
    %77 = tpu.concatenate %76, %75, %76 in 1 : vector<8x17xf32>, vector<8x256xf32>, vector<8x17xf32> -> vector<8x290xf32>
    %78 = tpu.iota {dimensions = array<i32: 1>} : vector<1x256xi32>
    %c16_i32_22 = arith.constant 16 : i32
    %c0_i32_23 = arith.constant 0 : i32
    %79 = arith.cmpi eq, %c16_i32_22, %c0_i32_23 : i32
    %c1_i32_24 = arith.constant 1 : i32
    %80 = arith.select %79, %c1_i32_24, %c16_i32_22 : i32
    %81 = vector.broadcast %80 : i32 to vector<1x256xi32>
    %82 = arith.remsi %78, %81 : vector<1x256xi32>
    %c0_i32_25 = arith.constant 0 : i32
    %83 = vector.broadcast %c0_i32_25 : i32 to vector<1x256xi32>
    %84 = arith.cmpi ne, %82, %83 : vector<1x256xi32>
    %c0_i32_26 = arith.constant 0 : i32
    %85 = vector.broadcast %c0_i32_26 : i32 to vector<1x256xi32>
    %86 = arith.cmpi slt, %82, %85 : vector<1x256xi32>
    %c0_i32_27 = arith.constant 0 : i32
    %87 = arith.cmpi slt, %80, %c0_i32_27 : i32
    %88 = vector.broadcast %87 : i1 to vector<1x256xi1>
    %89 = vector.broadcast %88 : vector<1x256xi1> to vector<1x256xi1>
    %90 = arith.xori %86, %89 : vector<1x256xi1>
    %91 = arith.andi %90, %84 : vector<1x256xi1>
    %92 = vector.broadcast %80 : i32 to vector<1x256xi32>
    %93 = arith.addi %82, %92 : vector<1x256xi32>
    %94 = arith.select %91, %93, %82 : vector<1x256xi1>, vector<1x256xi32>
    %c1_i32_28 = arith.constant 1 : i32
    %95 = vector.broadcast %c1_i32_28 : i32 to vector<1x256xi32>
    %96 = arith.cmpi sge, %94, %95 : vector<1x256xi32>
    %c14_i32_29 = arith.constant 14 : i32
    %97 = vector.broadcast %c14_i32_29 : i32 to vector<1x256xi32>
    %98 = arith.cmpi sle, %94, %97 : vector<1x256xi32>
    %99 = vector.extract_strided_slice %77 {offsets = [0, 0], sizes = [8, 256], strides = [1, 1]} : vector<8x290xf32> to vector<8x256xf32>
    %cst_30 = arith.constant 0.000000e+00 : f32
    %100 = vector.shape_cast %96 : vector<1x256xi1> to vector<1x256xi1>
    %101 = vector.broadcast %100 : vector<1x256xi1> to vector<8x256xi1>
    %102 = vector.broadcast %cst_30 : f32 to vector<8x256xf32>
    %103 = arith.select %101, %99, %102 : vector<8x256xi1>, vector<8x256xf32>
    %104 = vector.extract_strided_slice %77 {offsets = [0, 1], sizes = [8, 256], strides = [1, 1]} : vector<8x290xf32> to vector<8x256xf32>
    %105 = vector.extract_strided_slice %77 {offsets = [0, 2], sizes = [8, 256], strides = [1, 1]} : vector<8x290xf32> to vector<8x256xf32>
    %cst_31 = arith.constant 0.000000e+00 : f32
    %106 = vector.shape_cast %98 : vector<1x256xi1> to vector<1x256xi1>
    %107 = vector.broadcast %106 : vector<1x256xi1> to vector<8x256xi1>
    %108 = vector.broadcast %cst_31 : f32 to vector<8x256xf32>
    %109 = arith.select %107, %105, %108 : vector<8x256xi1>, vector<8x256xf32>
    %110 = vector.extract_strided_slice %77 {offsets = [0, 16], sizes = [8, 256], strides = [1, 1]} : vector<8x290xf32> to vector<8x256xf32>
    %cst_32 = arith.constant 0.000000e+00 : f32
    %111 = vector.shape_cast %96 : vector<1x256xi1> to vector<1x256xi1>
    %112 = vector.broadcast %111 : vector<1x256xi1> to vector<8x256xi1>
    %113 = vector.broadcast %cst_32 : f32 to vector<8x256xf32>
    %114 = arith.select %112, %110, %113 : vector<8x256xi1>, vector<8x256xf32>
    %115 = vector.extract_strided_slice %77 {offsets = [0, 17], sizes = [8, 256], strides = [1, 1]} : vector<8x290xf32> to vector<8x256xf32>
    %116 = vector.extract_strided_slice %77 {offsets = [0, 18], sizes = [8, 256], strides = [1, 1]} : vector<8x290xf32> to vector<8x256xf32>
    %cst_33 = arith.constant 0.000000e+00 : f32
    %117 = vector.shape_cast %98 : vector<1x256xi1> to vector<1x256xi1>
    %118 = vector.broadcast %117 : vector<1x256xi1> to vector<8x256xi1>
    %119 = vector.broadcast %cst_33 : f32 to vector<8x256xf32>
    %120 = arith.select %118, %116, %119 : vector<8x256xi1>, vector<8x256xf32>
    %121 = vector.extract_strided_slice %77 {offsets = [0, 32], sizes = [8, 256], strides = [1, 1]} : vector<8x290xf32> to vector<8x256xf32>
    %cst_34 = arith.constant 0.000000e+00 : f32
    %122 = vector.shape_cast %96 : vector<1x256xi1> to vector<1x256xi1>
    %123 = vector.broadcast %122 : vector<1x256xi1> to vector<8x256xi1>
    %124 = vector.broadcast %cst_34 : f32 to vector<8x256xf32>
    %125 = arith.select %123, %121, %124 : vector<8x256xi1>, vector<8x256xf32>
    %126 = vector.extract_strided_slice %77 {offsets = [0, 33], sizes = [8, 256], strides = [1, 1]} : vector<8x290xf32> to vector<8x256xf32>
    %127 = vector.extract_strided_slice %77 {offsets = [0, 34], sizes = [8, 256], strides = [1, 1]} : vector<8x290xf32> to vector<8x256xf32>
    %cst_35 = arith.constant 0.000000e+00 : f32
    %128 = vector.shape_cast %98 : vector<1x256xi1> to vector<1x256xi1>
    %129 = vector.broadcast %128 : vector<1x256xi1> to vector<8x256xi1>
    %130 = vector.broadcast %cst_35 : f32 to vector<8x256xf32>
    %131 = arith.select %129, %127, %130 : vector<8x256xi1>, vector<8x256xf32>
    %132 = tpu.concatenate %103, %104, %109, %114, %115, %120, %125, %126, %131 in 0 : vector<8x256xf32>, vector<8x256xf32>, vector<8x256xf32>, vector<8x256xf32>, vector<8x256xf32>, vector<8x256xf32>, vector<8x256xf32>, vector<8x256xf32>, vector<8x256xf32> -> vector<72x256xf32>
    %c0_36 = arith.constant 0 : index
    %c0_37 = arith.constant 0 : index
    %133 = vector.load %arg4[%c0_36, %c0_37] : memref<8x72xf32, #tpu.memory_space<vmem>>, vector<8x72xf32>
    %cst_38 = arith.constant dense<0.000000e+00> : vector<8x256xf32>
    %134 = tpu.matmul %133, %132, %cst_38 {dimension_numbers = #tpu.dot_dimension_numbers<[1], [0], [0], [1], [0, 0, 1, 1], [], []>} : vector<8x72xf32>, vector<72x256xf32>, vector<8x256xf32> -> vector<8x256xf32>
    %c0_39 = arith.constant 0 : index
    %c0_40 = arith.constant 0 : index
    %135 = vector.load %arg5[%c0_39, %c0_40] : memref<8x1xf32, #tpu.memory_space<vmem>>, vector<8x1xf32>
    %136 = vector.broadcast %135 : vector<8x1xf32> to vector<8x256xf32>
    %137 = arith.addf %134, %136 : vector<8x256xf32>
    %138 = arith.addf %69, %137 : vector<8x256xf32>
    %c0_41 = arith.constant 0 : index
    %c0_42 = arith.constant 0 : index
    %139 = vector.load %arg6[%c0_41, %c0_42] : memref<256x64xf32, #tpu.memory_space<vmem>>, vector<256x64xf32>
    %cst_43 = arith.constant dense<0.000000e+00> : vector<8x64xf32>
    %140 = tpu.matmul %138, %139, %cst_43 {dimension_numbers = #tpu.dot_dimension_numbers<[1], [0], [0], [1], [0, 0, 1, 1], [], []>} : vector<8x256xf32>, vector<256x64xf32>, vector<8x64xf32> -> vector<8x64xf32>
    %c0_44 = arith.constant 0 : index
    %c0_45 = arith.constant 0 : index
    %c0_46 = arith.constant 0 : index
    %141 = vector.load %arg7[%c0_44, %c0_45, %c0_46] : memref<1x8x64xf32, #tpu.memory_space<vmem>>, vector<1x8x64xf32>
    %142 = vector.shape_cast %141 : vector<1x8x64xf32> to vector<8x64xf32>
    %143 = vector.shape_cast %140 : vector<8x64xf32> to vector<1x8x64xf32>
    tpu.vector_store %arg7[%c0_44, %c0_45, %c0_46], %143 {strides = array<i32>} : memref<1x8x64xf32, #tpu.memory_space<vmem>>, vector<1x8x64xf32>,
    return
  }
  func.func @transform_0(%arg0: i32) -> (i32, i32, i32) {
    %c0_i32 = arith.constant 0 : i32
    %c0_i32_0 = arith.constant 0 : i32
    %c0_i32_1 = arith.constant 0 : i32
    return %arg0, %c0_i32, %c0_i32_0 : i32, i32, i32
  }
  func.func @transform_1(%arg0: i32) -> (i32, i32) {
    %c0_i32 = arith.constant 0 : i32
    %c0_i32_0 = arith.constant 0 : i32
    %c0_i32_1 = arith.constant 0 : i32
    return %c0_i32, %c0_i32_0 : i32, i32
  }
  func.func @transform_2(%arg0: i32) -> (i32, i32) {
    %c0_i32 = arith.constant 0 : i32
    %c0_i32_0 = arith.constant 0 : i32
    %c0_i32_1 = arith.constant 0 : i32
    return %c0_i32, %c0_i32_0 : i32, i32
  }
  func.func @transform_3(%arg0: i32) -> (i32, i32) {
    %c0_i32 = arith.constant 0 : i32
    %c0_i32_0 = arith.constant 0 : i32
    %c0_i32_1 = arith.constant 0 : i32
    return %c0_i32, %c0_i32_0 : i32, i32
  }
  func.func @transform_4(%arg0: i32) -> (i32, i32) {
    %c0_i32 = arith.constant 0 : i32
    %c0_i32_0 = arith.constant 0 : i32
    %c0_i32_1 = arith.constant 0 : i32
    return %c0_i32, %c0_i32_0 : i32, i32
  }
  func.func @transform_5(%arg0: i32) -> (i32, i32) {
    %c0_i32 = arith.constant 0 : i32
    %c0_i32_0 = arith.constant 0 : i32
    %c0_i32_1 = arith.constant 0 : i32
    return %c0_i32, %c0_i32_0 : i32, i32
  }
  func.func @transform_6(%arg0: i32) -> (i32, i32, i32) {
    %c0_i32 = arith.constant 0 : i32
    %c0_i32_0 = arith.constant 0 : i32
    %c0_i32_1 = arith.constant 0 : i32
    return %arg0, %c0_i32, %c0_i32_0 : i32, i32, i32
  }
}

</mosaic_0001>

<bundles_post_ra>
// kernel: resblock_forward.1
= control target key start
LH: loop header
LB: loop body
LE: loop exit
PB: predicated region body
PF: predicated region fallthrough
CT: control target
= control target key end

     0   :  { %11 = vsyncpa [#allocation3], 0  ;;  %s1056_s21 = smov 0   ;;  %s1291_s0 = inlined_call_operand.vmem [shape: f32[2,4,256], index: 0, kind: input, shape index: {}]   ;;  %s1292_s1 = inlined_call_operand.vmem [shape: f32[16,40], index: 1, kind: input, shape index: {}]   ;;  %s1293_s2 = inlined_call_operand.vmem [shape: f32[16,1], index: 2, kind: input, shape index: {}]   ;;  %s1294_s3 = inlined_call_operand.vmem [shape: f32[8,72], index: 3, kind: input, shape index: {}]   ;;  %s1295_s4 = inlined_call_operand.vmem [shape: f32[8,1], index: 4, kind: input, shape index: {}]   ;;  %s1296_s5 = inlined_call_operand.hbm [shape: f32[256,64], index: 5, kind: input, shape index: {}]   ;;  %s1297_s6 = inlined_call_operand.vmem [shape: f32[2,8,64], index: 6, kind: output, shape index: {}]  }
   0x1 LB: > { %s202_s24 = sshll.u32 %s1296_s5, 4  ;;  %s842_s25 = sadd.s32 4294967295, %s1006_s21   ;;  %s1006_s21 = sphi %s1056_s21, %s17_s21   ;;  %s203_s24 = int_to_ptr.hbm [resolvable:$true] %s202_s24 }
   0x2   : > { %p844_p0 = scmp.ge.s32.totalorder %s1006_s21, 1  ;;  %p179_p1 = scmp.lt.s32.totalorder %s1006_s21, 3 }
   0x3   : > { %p881_p2 = scmp.eq.s32.totalorder %s842_s25, 0  ;;  %s1008_s26 = smov [#allocation2]  }
   0x4   : > { %p180_p3 = pnand %p844_p0, %p179_p1  ;;  %s204_s27 = sshll.u32 %s1008_s26, 4  ;;  %s205_s27 = int_to_ptr.vmem [resolvable:$true] %s204_s27 }
   0x5   : > { %s1009_s28 = smov 128   ;;  %s1010_s29 = smov 8  }
   0x6   : > { %p877_p4 = pneg %p180_p3  ;;  %228 = sbr.rel (%p180_p3) target bundleno = 1004 (0x3ec), region = 44 }
   0x8   : > { %p878_p5 = pnand %p881_p2, %p877_p4 }
   0xa   : > { %880 = dma.hbm_to_vmem [thread:$0]  (!%p878_p5), %s203_s24, 4096, %s205_s27, [#allocation3], %s1009_s28, %s1009_s28, %s1010_s29  }
   0xb   : > { %1001 = dma.done.wait (%p881_p2), [#allocation3], 4096  }
   0xc   : > { %1003 = vsyncadd (%p881_p2), [#allocation3], 4294963200  ;;  %p258_p6 = scmp.lt.s32.totalorder %s842_s25, 1  ;;  %s1011_s10 = smov 17   ;;  %vm279_vm1 = vcmask 138240   ;;  %v286_v17 = vlaneseq  ;;  %vm387_vm2 = vcmask 769024  }
   0xd   : > { %s1012_s11 = smov 96   ;;  %s1013_s12 = smov 94   ;;  %vm449_vm5 = vcmask 777216   ;;  %vm460_vm6 = vcmask 1043456   ;;  %vm374_vm7 = vcmask 785408   ;;  %vm361_vm10 = vcmask 900096  }
   0xe   : > { %s1307_s25 = smov (!%p258_p6, %s842_s25), 1  ;;  %s1014_s13 = smov 95   ;;  %v287_v19 = vand.u32 127, %v286_v17  ;;  %vm335_vm11 = vcmask 1031168   ;;  %vm348_vm12 = vcmask 916480   ;;  %vm432_vm13 = vcmask 908288  }
   0xf   : > { %s872_s30 = sshll.u32 %s1307_s25, 3  ;;  %s1015_s14 = smov 110   ;;  %vm412_vm14 = vcmask 1039360   ;;  %vm485_vm15 = vcmask 326656  }
  0x10   : > { %s262_s9 = scalar_lea.vmem %s1291_s0, %s872_s30  ;;  %s1016_s15 = smov 126   ;;  %v288_v20 = vadd.s32 128, %v287_v19  ;;  %v293_v23 = vand.u32 15, %v287_v19 }
  0x11   : > { %v267_v0 = vld [vmem:[%s262_s9] sm:$0xff]  ;;  %s1017_s16 = smov 112   ;;  %s1018_s17 = smov 111  }
  0x12   : > { %vm268_vm0 = vcmp.gt.f32.partialorder %v267_v0, 0.0  ;;  %v269_v1 = vmul.f32 0.2, %v267_v0  ;;  %s1019_s18 = smov 127   ;;  %v300_v25 = vand.u32 15, %v288_v20  ;;  %vm1103_vm3 = vcmp.le.s32.totalorder %v293_v23, 14 }
  0x13   : > { %vm1123_vm8 = vcmp.ge.s32.totalorder %v293_v23, 1 }
  0x14   : > { %v270_v2 = vsel %vm268_vm0, %v267_v0, %v269_v1  ;;  %vm1107_vm4 = vcmp.le.s32.totalorder %v300_v25, 14  ;;  %vm1127_vm9 = vcmp.ge.s32.totalorder %v300_v25, 1  ;;  %v474_v1 = vld [vmem:[%s1293_s2 + $0x8] sm:$0xff] }
  0x15   : > { %272 = vst [vmem:[#allocation1] ss:$2 sm:$0xff] %v270_v2  ;;  %v1020_v2 = vmov 0  }
  0x16   : > { %949 = vset.pattern.permute.xlu2 %v1020_v2  ;;  %965 = vset.pattern.permute.xlu0 %v1020_v2 }
  0x1c   : > { %v273_v3 = vld.sshfl [vmem:[#allocation1] sm:$0xff pattern:$0x75316420]  ;;  %v274_v4 = vld.sshfl [vmem:[#allocation1 + $0x8] sm:$0xff pattern:$0x75316420] }
  0x1d   : > { %v904_v5 = vpack.i.bf16 %v274_v4, %v273_v3  ;;  %395 = vst [vmem:[#allocation1] ss:$2 sm:$0xff] %v267_v0 }
  0x1f   : > { %905 = vrot.lane.b32.xlu0 %v904_v5, %s1011_s10 }
  0x91   : > { %v906_v6 = vpop.permute.xlu0 %905 }
  0x92   : > { %v908_v7 = vunpack.i.h.bf16 %v906_v6  ;;  %v907_v8 = vunpack.i.l.bf16 %v906_v6 }
  0x94   : > { %v285_v9 = vsel %vm279_vm1, %v908_v7, 0.0  ;;  %v1078_v10 = vsel %vm279_vm1, %v907_v8, %v908_v7  ;;  %v1081_v11 = vsel %vm279_vm1, 0.0, %v907_v8 }
  0x95   : > { %372 = vrot.lane.b32.xlu2 %v285_v9, %s1012_s11  ;;  %385 = vrot.lane.b32.xlu1 %v285_v9, %s1013_s12  ;;  %v909_v12 = vpack.i.bf16 %v1078_v10, %v1081_v11  ;;  %v423_v13 = vrot.slane %v1081_v11, 4  ;;  %v424_v14 = vrot.slane %v1078_v10, 4  ;;  %v425_v15 = vrot.slane %v285_v9, 4 }
  0x96   : > { %v321_v19 = vsel %vm1123_vm8, %v1081_v11, 0.0 }
  0x97   : > { %910 = vrot.lane.b32.xlu0 %v909_v12, %s1013_s12  ;;  %v939_v16 = vpack.i.bf16 %v424_v14, %v423_v13 }
  0x9d   : > { %920 = vrot.lane.b32.xlu2 %v909_v12, %s1014_s13  ;;  %915 = vrot.lane.b32.xlu1 %v909_v12, %s1012_s11 }
  0x9f   : > { %447 = vrot.lane.b32.xlu0 %v285_v9, %s1014_s13 }
  0xa5   : > { %359 = vrot.lane.b32.xlu2 %v285_v9, %s1015_s14  ;;  %925 = vrot.lane.b32.xlu1 %v909_v12, %s1015_s14 }
  0xa7   : > { %930 = vrot.lane.b32.xlu0 %v909_v12, %s1016_s15 }
  0xad   : > { %935 = vrot.lane.b32.xlu2 %v909_v12, %s1017_s16  ;;  %333 = vrot.lane.b32.xlu1 %v285_v9, %s1016_s15 }
  0xaf   : > { %346 = vrot.lane.b32.xlu0 %v285_v9, %s1017_s16 }
  0xb5   : > { %430 = vrot.lane.b32.xlu2 %v425_v15, %s1018_s17  ;;  %940 = vrot.lane.b32.xlu1 %v939_v16, %s1018_s17 }
  0xb7   : > { %945 = vrot.lane.b32.xlu0 %v909_v12, %s1019_s18 }
  0xbd   : > { %410 = vrot.lane.b32.xlu1 %v285_v9, %s1019_s18  ;;  %482 = vperm.xlu2 %949, %v474_v1  }
  0xef   : > { %v373_v18 = vpop.permute.xlu2 %372 }
  0xf7   : > { %v921_v22 = vpop.permute.xlu2 %920 }
  0xf8   : > { %v923_v29 = vunpack.i.h.bf16 %v921_v22  ;;  %v922_v30 = vunpack.i.l.bf16 %v921_v22 }
  0xfa   : > { %v450_v38 = vsel %vm449_vm5, %v922_v30, %v923_v29 }
  0xff   : > { %v360_v48 = vpop.permute.xlu2 %359 }
 0x107   : > { %v386_v21 = vpop.permute.xlu1 %385  ;;  %v936_v3 = vpop.permute.xlu2 %935 }
 0x108   : > { %v938_v8 = vunpack.i.h.bf16 %v936_v3  ;;  %v937_v9 = vunpack.i.l.bf16 %v936_v3  ;;  %v473_v3 = vld [vmem:[%s1293_s2] sm:$0xff] }
 0x109   : > { %v911_v24 = vpop.permute.xlu0 %910 }
 0x10a   : > { %v913_v26 = vunpack.i.h.bf16 %v911_v24  ;;  %v912_v27 = vunpack.i.l.bf16 %v911_v24  ;;  %v349_v14 = vsel %vm348_vm12, %v937_v9, %v938_v8 }
 0x10b   : > { %v353_v23 = vsel %vm1123_vm8, %v349_v14, 0.0 }
 0x10c   : > { %v388_v32 = vsel %vm387_vm2, %v912_v27, %v913_v26  ;;  %v389_v33 = vsel %vm387_vm2, %v913_v26, %v386_v21 }
 0x10d   : > { %v392_v34 = vsel %vm1103_vm3, %v388_v32, 0.0  ;;  %v393_v36 = vsel %vm1107_vm4, %v389_v33, 0.0  ;;  %v402_v33 = vrot.slane %v321_v19, 4 }
 0x10e   : > { %v456_v35 = vrot.slane %v392_v34, 4  ;;  %v457_v43 = vrot.slane %v393_v36, 4  ;;  %v396_v36 = vld.sshfl [vmem:[#allocation1] sm:$0xff pattern:$0x75316420] }
 0x10f   : > { %v916_v37 = vpop.permute.xlu1 %915  ;;  %v431_v20 = vpop.permute.xlu2 %430 }
 0x110   : > { %v918_v39 = vunpack.i.h.bf16 %v916_v37  ;;  %v917_v40 = vunpack.i.l.bf16 %v916_v37  ;;  %v469_v41 = vsel %vm460_vm6, %v450_v38, %v456_v35  ;;  %v322_v37 = vsel %vm1127_vm9, %v1078_v10, 0.0 }
 0x111   : > { %v448_v42 = vpop.permute.xlu0 %447  ;;  %503 = vmatpush.msra.mxu2 %v469_v41 }
 0x112   : > { %v451_v44 = vsel %vm449_vm5, %v923_v29, %v448_v42  ;;  %v375_v46 = vsel %vm374_vm7, %v917_v40, %v918_v39  ;;  %v376_v47 = vsel %vm374_vm7, %v918_v39, %v373_v18  ;;  %v471_v39 = vld [vmem:[%s1292_s1] sm:$0xff]  ;;  %v461_v42 = vsel %vm460_vm6, %v396_v36, %v402_v33  ;;  %v733_v33 = vld [vmem:[#allocation2 + $0xf0] sm:$0xff] }
 0x113   : > { %v470_v45 = vsel %vm460_vm6, %v451_v44, %v457_v43  ;;  %v379_v52 = vsel %vm1123_vm8, %v375_v46, 0.0  ;;  %v380_v53 = vsel %vm1127_vm9, %v376_v47, 0.0  ;;  %v403_v43 = vrot.slane %v322_v37, 4  ;;  %v472_v47 = vld [vmem:[%s1292_s1 + $0x8] sm:$0xff]  ;;  %v716_v37 = vld [vmem:[#allocation2 + $0x68] sm:$0xff] }
 0x114   : > { %526 = vmatpush.msra.mxu3 %v470_v45  ;;  %v439_v58 = vrot.slane %v379_v52, 4  ;;  %v440_v60 = vrot.slane %v380_v53, 4  ;;  %v397_v45 = vld.sshfl [vmem:[#allocation1 + $0x8] sm:$0xff pattern:$0x75316420] }
 0x115   : > { %v462_v46 = vsel %vm460_vm6, %v397_v45, %v403_v43  ;;  %v730_v45 = vld [vmem:[#allocation2 + $0xd8] sm:$0xff] }
 0x117   : > { %v926_v51 = vpop.permute.xlu1 %925  ;;  %v483_v52 = vpop.permute.xlu2 %482 }
 0x118   : > { %v928_v54 = vunpack.i.h.bf16 %v926_v51  ;;  %v927_v55 = vunpack.i.l.bf16 %v926_v51 }
 0x119   : > { %v931_v56 = vpop.permute.xlu0 %930 }
 0x11a   : > { %v362_v57 = vsel %vm361_vm10, %v927_v55, %v928_v54  ;;  %v363_v59 = vsel %vm361_vm10, %v928_v54, %v360_v48  ;;  %v933_v5 = vunpack.i.h.bf16 %v931_v56  ;;  %v932_v6 = vunpack.i.l.bf16 %v931_v56 }
 0x11b   : > { %v366_v61 = vsel %vm1103_vm3, %v362_v57, 0.0  ;;  %v367_v62 = vsel %vm1107_vm4, %v363_v59, 0.0 }
 0x11c   : > { %v467_v63 = vsel %vm460_vm6, %v366_v61, %v439_v58  ;;  %v468_v0 = vsel %vm460_vm6, %v367_v62, %v440_v60  ;;  %v336_v12 = vsel %vm335_vm11, %v932_v6, %v933_v5 }
 0x11d   : > { %504 = vmatpush.msra.mxu2 %v467_v63  ;;  %527 = vmatpush.msra.mxu3 %v468_v0  ;;  %v340_v18 = vsel %vm1103_vm3, %v336_v12, 0.0 }
 0x11e   : > { %v419_v32 = vrot.slane %v340_v18, 4 }
 0x11f   : > { %v334_v4 = vpop.permute.xlu1 %333 }
 0x120   : > { %v337_v21 = vsel %vm335_vm11, %v933_v5, %v334_v4 }
 0x121   : > { %v347_v7 = vpop.permute.xlu0 %346  ;;  %v341_v34 = vsel %vm1107_vm4, %v337_v21, 0.0 }
 0x122   : > { %v350_v13 = vsel %vm348_vm12, %v938_v8, %v347_v7  ;;  %v420_v40 = vrot.slane %v341_v34, 4 }
 0x123   : > { %v354_v24 = vsel %vm1127_vm9, %v350_v13, 0.0 }
 0x127   : > { %v941_v15 = vpop.permute.xlu1 %940 }
 0x128   : > { %v943_v16 = vunpack.i.h.bf16 %v941_v15  ;;  %v942_v17 = vunpack.i.l.bf16 %v941_v15 }
 0x129   : > { %v946_v22 = vpop.permute.xlu0 %945 }
 0x12a   : > { %v948_v25 = vunpack.i.h.bf16 %v946_v22  ;;  %v947_v26 = vunpack.i.l.bf16 %v946_v22  ;;  %v433_v27 = vsel %vm432_vm13, %v942_v17, %v943_v16  ;;  %v434_v29 = vsel %vm432_vm13, %v943_v16, %v431_v20 }
 0x12b   : > { %v465_v30 = vsel %vm460_vm6, %v353_v23, %v433_v27  ;;  %v466_v11 = vsel %vm460_vm6, %v354_v24, %v434_v29  ;;  %v718_v27 = vld [vmem:[#allocation2 + $0x78] sm:$0xff] }
 0x12c   : > { %505 = vmatpush.msra.mxu2 %v465_v30  ;;  %528 = vmatpush.msra.mxu3 %v466_v11  ;;  %v413_v35 = vsel %vm412_vm14, %v947_v26, %v948_v25  ;;  %v651_v26 = vld [vmem:[%s1295_s4] sm:$0xff] }
 0x12d   : > { %v463_v38 = vsel %vm460_vm6, %v413_v35, %v419_v32  ;;  %v734_v29 = vld [vmem:[#allocation2 + $0xf8] sm:$0xff]  ;;  %735 = vmatpush.msra.mxu0 %v718_v27  ;;  %v717_v32 = vld [vmem:[#allocation2 + $0x70] sm:$0xff] }
 0x12e   : > { %506 = vmatpush.msra.mxu2 %v463_v38  ;;  %755 = vmatpush.msra.mxu1 %v734_v29  ;;  %v732_v38 = vld [vmem:[#allocation2 + $0xe8] sm:$0xff] }
 0x12f   : > { %v411_v41 = vpop.permute.xlu1 %410  ;;  %736 = vmatpush.msra.mxu0 %v717_v32 }
 0x130   : > { %v414_v44 = vsel %vm412_vm14, %v948_v25, %v411_v41  ;;  %507 = vmatpush.msra.mxu2 %v461_v42  ;;  %756 = vmatpush.msra.mxu1 %v733_v33  ;;  %v715_v41 = vld [vmem:[#allocation2 + $0x60] sm:$0xff] }
 0x131   : > { %852 = vmatmul.msk.f32.vlgmr.msra.gmra.mxu2 %vm485_vm15, %v471_v39  ;;  %v464_v10 = vsel %vm460_vm6, %v414_v44, %v420_v40  ;;  %v731_v42 = vld [vmem:[#allocation2 + $0xe0] sm:$0xff]  ;;  %737 = vmatpush.msra.mxu0 %v716_v37  ;;  %v714_v44 = vld [vmem:[#allocation2 + $0x58] sm:$0xff] }
 0x132   : > { %529 = vmatpush.msra.mxu3 %v464_v10  ;;  %757 = vmatpush.msra.mxu1 %v732_v38 }
 0x133   : > { %738 = vmatpush.msra.mxu0 %v715_v41 }
 0x134   : > { %530 = vmatpush.msra.mxu3 %v462_v46  ;;  %758 = vmatpush.msra.mxu1 %v731_v42 }
 0x135   : > { %854 = vmatmul.msk.f32.vlgmr.msra.gmra.mxu3 %vm485_vm15, %v471_v39  ;;  %739 = vmatpush.msra.mxu0 %v714_v44 }
 0x136   : > { %759 = vmatpush.msra.mxu1 %v730_v45 }
 0x139   : > { %853 = vmatmul.msk.f32.gmra.mxu2 %vm485_vm15, %v472_v47 }
 0x13d   : > { %855 = vmatmul.msk.f32.gmra.mxu3 %vm485_vm15, %v472_v47  ;;  %v713_v47 = vld [vmem:[#allocation2 + $0x50] sm:$0xff] }
 0x13e   : > { %740 = vmatpush.msra.mxu0 %v713_v47 }
 0x1b4   : > { %v1184_v48 = vpop.f32.mrf.mxu2 }
 0x1b8   : > { %v1186_v51 = vpop.f32.mrf.mxu3 }
 0x1bc   : > { %v512_v53 = vpop.f32.mrf.mxu2 }
 0x1bd   : > { %v513_v54 = vadd.f32 %v512_v53, %v483_v52 }
 0x1bf   : > { %v540_v55 = vmul.f32 0.2, %v513_v54  ;;  %vm538_vm0 = vcmp.gt.f32.partialorder %v513_v54, 0.0 }
 0x1c0   : > { %v535_v56 = vpop.f32.mrf.mxu3 }
 0x1c1   : > { %v536_v57 = vadd.f32 %v535_v56, %v483_v52  ;;  %v542_v58 = vsel %vm538_vm0, %v513_v54, %v540_v55  ;;  %v729_v52 = vld [vmem:[#allocation2 + $0xd0] sm:$0xff]  ;;  %v712_v55 = vld [vmem:[#allocation2 + $0x48] sm:$0xff] }
 0x1c2   : > { %546 = vrot.lane.b32.xlu0 %v542_v58, %s1011_s10  ;;  %v728_v56 = vld [vmem:[#allocation2 + $0xc8] sm:$0xff]  ;;  %760 = vmatpush.msra.mxu1 %v729_v52  ;;  %v727_v58 = vld [vmem:[#allocation2 + $0xc0] sm:$0xff] }
 0x1c3   : > { %v541_v59 = vmul.f32 0.2, %v536_v57  ;;  %vm539_vm6 = vcmp.gt.f32.partialorder %v536_v57, 0.0  ;;  %741 = vmatpush.msra.mxu0 %v712_v55 }
 0x1c4   : > { %761 = vmatpush.msra.mxu1 %v728_v56 }
 0x1c5   : > { %v543_v60 = vsel %vm539_vm6, %v536_v57, %v541_v59  ;;  %v711_v57 = vld [vmem:[#allocation2 + $0x40] sm:$0xff]  ;;  %v710_v59 = vld [vmem:[#allocation2 + $0x38] sm:$0xff] }
 0x1c6   : > { %548 = vrot.lane.b32.xlu1 %v543_v60, %s1011_s10  ;;  %v726_v60 = vld [vmem:[#allocation2 + $0xb8] sm:$0xff]  ;;  %742 = vmatpush.msra.mxu0 %v711_v57 }
 0x1c7   : > { %762 = vmatpush.msra.mxu1 %v727_v58 }
 0x1c8   : > { %743 = vmatpush.msra.mxu0 %v710_v59 }
 0x1c9   : > { %763 = vmatpush.msra.mxu1 %v726_v60 }
 0x234   : > { %v547_v61 = vpop.permute.xlu0 %546 }
 0x235   : > { %v1191_v62 = vsel %vm279_vm1, 0.0, %v547_v61 }
 0x236   : > { %608 = vrot.lane.b32.xlu2 %v1191_v62, %s1013_s12 }
 0x238   : > { %v549_v63 = vpop.permute.xlu1 %548 }
 0x239   : > { %v1196_v0 = vsel %vm279_vm1, %v547_v61, %v549_v63  ;;  %v555_v1 = vsel %vm279_vm1, %v549_v63, 0.0  ;;  %vm657_vm1 = vcmask 588800  }
 0x23a   : > { %612 = vrot.lane.b32.xlu1 %v555_v1, %s1013_s12  ;;  %610 = vrot.lane.b32.xlu0 %v1196_v0, %s1013_s12  ;;  %v950_v2 = vpack.i.bf16 %v1196_v0, %v1191_v62  ;;  %s266_s12 = scalar_lea.vmem %s1297_s6, %s872_s30 }
 0x23e   : > { %951 = vrot.lane.b32.xlu2 %v950_v2, %s1014_s13 }
 0x242   : > { %596 = vrot.lane.b32.xlu1 %v1191_v62, %s1012_s11  ;;  %644 = vrot.lane.b32.xlu0 %v555_v1, %s1014_s13 }
 0x246   : > { %598 = vrot.lane.b32.xlu2 %v1196_v0, %s1012_s11 }
 0x24a   : > { %584 = vrot.lane.b32.xlu1 %v1191_v62, %s1015_s14  ;;  %600 = vrot.lane.b32.xlu0 %v555_v1, %s1012_s11 }
 0x24e   : > { %586 = vrot.lane.b32.xlu2 %v1196_v0, %s1015_s14 }
 0x252   : > { %956 = vrot.lane.b32.xlu1 %v950_v2, %s1018_s17  ;;  %588 = vrot.lane.b32.xlu0 %v555_v1, %s1015_s14 }
 0x256   : > { %634 = vrot.lane.b32.xlu2 %v555_v1, %s1018_s17 }
 0x25a   : > { %574 = vrot.lane.b32.xlu1 %v1196_v0, %s1017_s16  ;;  %572 = vrot.lane.b32.xlu0 %v1191_v62, %s1017_s16 }
 0x25e   : > { %576 = vrot.lane.b32.xlu2 %v555_v1, %s1017_s16 }
 0x262   : > { %562 = vrot.lane.b32.xlu1 %v1196_v0, %s1016_s15  ;;  %560 = vrot.lane.b32.xlu0 %v1191_v62, %s1016_s15 }
 0x266   : > { %564 = vrot.lane.b32.xlu2 %v555_v1, %s1016_s15 }
 0x26a   : > { %624 = vrot.lane.b32.xlu1 %v555_v1, %s1019_s18  ;;  %961 = vrot.lane.b32.xlu0 %v950_v2, %s1019_s18  ;;  %v709_v2 = vld [vmem:[#allocation2 + $0x30] sm:$0xff] }
 0x26b   : > { %744 = vmatpush.msra.mxu0 %v709_v2 }
 0x26e   : > { %477 = vperm.xlu2 %949, %v473_v3   ;;  %v725_v3 = vld [vmem:[#allocation2 + $0xb0] sm:$0xff] }
 0x26f   : > { %764 = vmatpush.msra.mxu1 %v725_v3 }
 0x272   : > { %654 = vperm.xlu0 %965, %v651_v26  }
 0x290   : > { %v609_v4 = vpop.permute.xlu2 %608 }
 0x298   : > { %v952_v5 = vpop.permute.xlu2 %951 }
 0x299   : > { %v954_v6 = vunpack.i.h.bf16 %v952_v5  ;;  %v953_v7 = vunpack.i.l.bf16 %v952_v5 }
 0x29b   : > { %v646_v15 = vsel %vm449_vm5, %v953_v7, %v954_v6  ;;  %v724_v7 = vld [vmem:[#allocation2 + $0xa8] sm:$0xff] }
 0x29c   : > { %765 = vmatpush.msra.mxu1 %v724_v7 }
 0x2a0   : > { %v599_v8 = vpop.permute.xlu2 %598 }
 0x2a8   : > { %v587_v18 = vpop.permute.xlu2 %586 }
 0x2ac   : > { %v613_v9 = vpop.permute.xlu1 %612  ;;  %v611_v12 = vpop.permute.xlu0 %610 }
 0x2ad   : > { %v614_v13 = vsel %vm387_vm2, %v609_v4, %v611_v12  ;;  %v615_v14 = vsel %vm387_vm2, %v611_v12, %v613_v9  ;;  %v723_v9 = vld [vmem:[#allocation2 + $0xa0] sm:$0xff]  ;;  %v706_v12 = vld [vmem:[#allocation2 + $0x18] sm:$0xff]  ;;  %vm775_vm2 = vcmask 523264  }
 0x2ae   : > { %856 = vmatpush.msk.msrb.mxu2 %vm1103_vm3, %v614_v13  ;;  %863 = vmatpush.msk.msrb.mxu3 %vm1107_vm4, %v615_v14  ;;  %v722_v13 = vld [vmem:[#allocation2 + $0x98] sm:$0xff] }
 0x2af   : > { %766 = vmatpush.msra.mxu1 %v723_v9 }
 0x2b0   : > { %669 = vmatpush.msrb.mxu2 %v646_v15  ;;  %v635_v25 = vpop.permute.xlu2 %634  ;;  %v705_v15 = vld [vmem:[#allocation2 + $0x10] sm:$0xff] }
 0x2b1   : > { %767 = vmatpush.msra.mxu1 %v722_v13 }
 0x2b4   : > { %v597_v16 = vpop.permute.xlu1 %596  ;;  %v645_v17 = vpop.permute.xlu0 %644 }
 0x2b5   : > { %v602_v19 = vsel %vm374_vm7, %v597_v16, %v599_v8  ;;  %v647_v20 = vsel %vm449_vm5, %v954_v6, %v645_v17  ;;  %v708_v6 = vld [vmem:[#allocation2 + $0x28] sm:$0xff]  ;;  %v721_v16 = vld [vmem:[#allocation2 + $0x90] sm:$0xff] }
 0x2b6   : > { %857 = vmatpush.msk.msrb.mxu2 %vm1123_vm8, %v602_v19  ;;  %689 = vmatpush.msrb.mxu3 %v647_v20  ;;  %v650_v20 = vld [vmem:[%s1294_s3] sm:$0xff] }
 0x2b7   : > { %745 = vmatpush.msra.mxu0 %v708_v6  ;;  %768 = vmatpush.msra.mxu1 %v721_v16 }
 0x2b8   : > { %v577_v43 = vpop.permute.xlu2 %576 }
 0x2bc   : > { %v585_v21 = vpop.permute.xlu1 %584  ;;  %v601_v22 = vpop.permute.xlu0 %600 }
 0x2bd   : > { %v590_v23 = vsel %vm361_vm10, %v585_v21, %v587_v18  ;;  %v603_v24 = vsel %vm374_vm7, %v599_v8, %v601_v22  ;;  %v707_v8 = vld [vmem:[#allocation2 + $0x20] sm:$0xff]  ;;  %v704_v21 = vld [vmem:[#allocation2 + $0x8] sm:$0xff] }
 0x2be   : > { %858 = vmatpush.msk.msrb.mxu2 %vm1103_vm3, %v590_v23  ;;  %864 = vmatpush.msk.msrb.mxu3 %vm1127_vm9, %v603_v24  ;;  %v720_v22 = vld [vmem:[#allocation2 + $0x88] sm:$0xff]  ;;  %v703_v23 = vld [vmem:[#allocation2] sm:$0xff] }
 0x2bf   : > { %746 = vmatpush.msra.mxu0 %v707_v8  ;;  %769 = vmatpush.msra.mxu1 %v720_v22  ;;  %v719_v24 = vld [vmem:[#allocation2 + $0x80] sm:$0xff] }
 0x2c0   : > { %v565_v61 = vpop.permute.xlu2 %564 }
 0x2c1   : > { %747 = vmatpush.msra.mxu0 %v706_v12  ;;  %770 = vmatpush.msra.mxu1 %v719_v24 }
 0x2c3   : > { %748 = vmatpush.msra.mxu0 %v705_v15 }
 0x2c4   : > { %v957_v30 = vpop.permute.xlu1 %956  ;;  %v589_v11 = vpop.permute.xlu0 %588 }
 0x2c5   : > { %v959_v34 = vunpack.i.h.bf16 %v957_v30  ;;  %v958_v35 = vunpack.i.l.bf16 %v957_v30  ;;  %v591_v36 = vsel %vm361_vm10, %v587_v18, %v589_v11  ;;  %749 = vmatpush.msra.mxu0 %v704_v21 }
 0x2c6   : > { %865 = vmatpush.msk.msrb.mxu3 %vm1107_vm4, %v591_v36 }
 0x2c7   : > { %v636_v39 = vsel %vm432_vm13, %v958_v35, %v959_v34  ;;  %v637_v40 = vsel %vm432_vm13, %v959_v34, %v635_v25  ;;  %750 = vmatpush.msra.mxu0 %v703_v23 }
 0x2c8   : > { %672 = vmatpush.msrb.mxu2 %v636_v39  ;;  %692 = vmatpush.msrb.mxu3 %v637_v40  ;;  %v478_v25 = vpop.permute.xlu2 %477 }
 0x2c9   : > { %v533_v50 = vadd.f32 %v1186_v51, %v478_v25 }
 0x2cc   : > { %v575_v10 = vpop.permute.xlu1 %574  ;;  %v573_v46 = vpop.permute.xlu0 %572 }
 0x2cd   : > { %v578_v53 = vsel %vm348_vm12, %v573_v46, %v575_v10  ;;  %v579_v54 = vsel %vm348_vm12, %v575_v10, %v577_v43 }
 0x2ce   : > { %859 = vmatpush.msk.msrb.mxu2 %vm1123_vm8, %v578_v53  ;;  %866 = vmatpush.msk.msrb.mxu3 %vm1127_vm9, %v579_v54 }
 0x2d4   : > { %v563_v63 = vpop.permute.xlu1 %562  ;;  %v561_v1 = vpop.permute.xlu0 %560 }
 0x2d5   : > { %v566_v4 = vsel %vm335_vm11, %v561_v1, %v563_v63  ;;  %v567_v5 = vsel %vm335_vm11, %v563_v63, %v565_v61 }
 0x2d6   : > { %860 = vmatpush.msk.msrb.mxu2 %vm1103_vm3, %v566_v4  ;;  %867 = vmatpush.msk.msrb.mxu3 %vm1107_vm4, %v567_v5 }
 0x2dc   : > { %v962_v14 = vpop.permute.xlu0 %961  ;;  %v625_v31 = vpop.permute.xlu1 %624 }
 0x2dd   : > { %v964_v28 = vunpack.i.h.bf16 %v962_v14  ;;  %v963_v17 = vunpack.i.l.bf16 %v962_v14 }
 0x2df   : > { %v626_v18 = vsel %vm412_vm14, %v963_v17, %v964_v28  ;;  %v627_v19 = vsel %vm412_vm14, %v964_v28, %v625_v31 }
 0x2e0   : > { %675 = vmatpush.msrb.mxu2 %v626_v18  ;;  %695 = vmatpush.msrb.mxu3 %v627_v19 }
 0x2e2   : > { %861 = vmatpush.msk.msrb.mxu2 %vm1123_vm8, %v1191_v62  ;;  %868 = vmatpush.msk.msrb.mxu3 %vm1127_vm9, %v1196_v0  ;;  %v510_v62 = vadd.f32 %v1184_v48, %v478_v25 }
 0x2e3   : > { %862 = vmatmul.msk.f32.vlgmr.msrb.gmra.mxu2 %vm657_vm1, %v650_v20  ;;  %869 = vmatmul.msk.f32.vlgmr.msrb.gmra.mxu3 %vm657_vm1, %v650_v20 }
 0x2e4   : > { %v655_v26 = vpop.permute.xlu0 %654 }
 0x366   : > { %v678_v27 = vpop.f32.mrf.mxu2  ;;  %v698_v49 = vpop.f32.mrf.mxu3 }
 0x367   : > { %v679_v0 = vadd.f32 %v678_v27, %v655_v26  ;;  %v699_v29 = vadd.f32 %v698_v49, %v655_v26 }
 0x369   : > { %v701_v30 = vadd.f32 %v679_v0, %v510_v62  ;;  %v702_v11 = vadd.f32 %v699_v29, %v533_v50 }
 0x36b   : > { %751 = vmatmul.f32.vlgmr.msra.gmra.mxu0 %v701_v30  ;;  %771 = vmatmul.f32.vlgmr.msra.gmra.mxu1 %v702_v11 }
 0x3e8   : > { %v752_v32 = vpop.f32.mrf.mxu0  ;;  %v772_v33 = vpop.f32.mrf.mxu1 }
 0x3e9   : > { %v773_v34 = vadd.f32 %v772_v33, %v752_v32 }
 0x3eb   : > { %776 = vst.msk [vmem:[%s266_s12] sm:$0xff] %vm775_vm2, %v773_v34 }
 0x3ec PF: > { %s17_s21 = sadd.s32 1, %s1006_s21  }
 0x3ed   : > { %p14_p7 = scmp.ge.s32.totalorder %s17_s21, 4  }
 0x3ef   :  { %16 = sbr.rel (!%p14_p7) target bundleno = 1 (0x1), region = 79 }
 0x3f4   :  { %796 = vsyncpa [#allocation3], 1 }
 0x3f5   :  { %798 = vsyncpa [#allocation3 + $0x1], 1 }

</bundles_post_ra>
